<compile_context>
chip_gen: v7x
topology: tpu7x:2x2x1
jax: 0.10.0
libtpu: 0.0.40
codegen_flags: <defaults>
</compile_context>

<pallas_src>
import jax
import jax.numpy as jnp
from jax.experimental import pallas as pl
from jax.experimental.pallas import tpu as pltpu

LANE = 128       # lane width: feature dims padded to this
SUB = 8          # sublane width: batch / row dims padded to this
MAX_T_CHUNK = 8  # timesteps fused per grid step (amortizes per-step overhead)


def _round_up(n, m):
    return ((n + m - 1) // m) * m


def _pad_to(x, size, axis):
    pad = size - x.shape[axis]
    if pad <= 0:
        return x
    widths = [(0, 0)] * x.ndim
    widths[axis] = (0, pad)
    return jnp.pad(x, widths)


# ---------------------------------------------------------------------------
# Kernel 1: recurrent chunk.  Grid axis = chunk-of-timesteps (sequential).
# Only the (cheap) tanh-cell lives on the serial dependency chain.
# ---------------------------------------------------------------------------
def rnn_chunk_kernel(x_ref,        # VMEM (TC, Bp, Hp)  embedded inputs for this chunk
                     h0_ref,       # VMEM (Bp, Hp)      initial hidden state
                     w_ih_ref,     # VMEM (Hp, Hp)      W_ih^T (padded)
                     w_hh_ref,     # VMEM (Hp, Hp)      W_hh^T (padded)
                     b_ref,        # VMEM (1, Hp)       b_ih + b_hh (padded)
                     h_out_ref,    # VMEM out (TC, Bp, Hp)
                     h_carry_ref): # VMEM scratch (Bp, Hp): hidden carried across chunks
    @pl.when(pl.program_id(0) == 0)
    def _():
        h_carry_ref[...] = h0_ref[...]

    tc = x_ref.shape[0]
    w_ih = w_ih_ref[...]
    w_hh = w_hh_ref[...]
    b = b_ref[...]

    def step(t, h_prev):
        x_t = x_ref[t]  # (Bp, Hp) slice along the leading (time) axis
        h_new = jnp.tanh(
            jnp.dot(x_t, w_ih, preferred_element_type=jnp.float32)
            + jnp.dot(h_prev, w_hh, preferred_element_type=jnp.float32)
            + b)
        h_out_ref[t] = h_new.astype(h_out_ref.dtype)
        return h_new

    # Short fixed trip-count: fully unrolled so LLO can schedule across steps.
    h_last = jax.lax.fori_loop(0, tc, step, h_carry_ref[...], unroll=True)
    h_carry_ref[...] = h_last  # hand the recurrent state to the next grid step


# ---------------------------------------------------------------------------
# Kernel 2: decoder over all timesteps at once (parallel grid over row tiles).
# ---------------------------------------------------------------------------
def decoder_kernel(h_ref,     # VMEM (TM, Hp)
                   w_ref,     # VMEM (Hp, Op)  W_dec^T (padded)
                   b_ref,     # VMEM (1, Op)   b_dec (padded)
                   out_ref):  # VMEM (TM, Op)
    out_ref[...] = (
        jnp.dot(h_ref[...], w_ref[...], preferred_element_type=jnp.float32)
        + b_ref[...]).astype(out_ref.dtype)


def prepare_params(params):
    """One-time kernel weight prep: transpose, fuse biases, pad lanes (inert zeros)."""
    H = params["w_ih"].shape[0]
    O = params["w_dec"].shape[0]
    Hp = _round_up(H, LANE)
    Op = _round_up(O, LANE)

    emb_p = _pad_to(params["emb"], Hp, axis=1)                       # (V, Hp)
    w_ih_t = _pad_to(_pad_to(params["w_ih"].T, Hp, 1), Hp, 0)        # (Hp, Hp)
    w_hh_t = _pad_to(_pad_to(params["w_hh"].T, Hp, 1), Hp, 0)        # (Hp, Hp)
    b_rnn = _pad_to((params["b_ih"] + params["b_hh"]).reshape(1, H), Hp, 1)
    w_dec_t = _pad_to(_pad_to(params["w_dec"].T, Op, 1), Hp, 0)      # (Hp, Op)
    b_dec = _pad_to(params["b_dec"].reshape(1, O), Op, 1)            # (1, Op)
    return {"emb": emb_p, "w_ih_t": w_ih_t, "w_hh_t": w_hh_t, "b_rnn": b_rnn,
            "w_dec_t": w_dec_t, "b_dec": b_dec,
            "H": H, "O": O, "Hp": Hp, "Op": Op}


def charrnn_forward_seq(tokens, hidden, prep):
    """tokens: (T, B) int32, hidden: (1, B, H) f32
       -> (logits (T, B, O) f32, hidden (1, B, H) f32)"""
    T, B = tokens.shape
    H, O, Hp, Op = prep["H"], prep["O"], prep["Hp"], prep["Op"]
    Bp = _round_up(B, SUB)
    t_chunk = min(MAX_T_CHUNK, T)
    Tp = _round_up(T, t_chunk)
    n_chunks = Tp // t_chunk

    # Embedding gather hoisted to one dense XLA gather (padded rows/steps are zeros
    # and only affect sliced-off outputs).
    x_seq = jnp.take(prep["emb"], tokens, axis=0)          # (T, B, Hp)
    x_seq = _pad_to(_pad_to(x_seq, Bp, axis=1), Tp, axis=0)  # (Tp, Bp, Hp)

    h0 = _pad_to(_pad_to(hidden[0], Hp, axis=1), Bp, axis=0)  # (Bp, Hp)

    def const(shape):
        return pl.BlockSpec(shape, lambda c: tuple(0 for _ in shape))

    # --- Recurrent pass: sequential over timestep chunks. ---
    h_seq = pl.pallas_call(
        rnn_chunk_kernel,
        out_shape=jax.ShapeDtypeStruct((Tp, Bp, Hp), jnp.float32),
        grid=(n_chunks,),
        in_specs=[pl.BlockSpec((t_chunk, Bp, Hp), lambda c: (c, 0, 0)),
                  const((Bp, Hp)),      # h0
                  const((Hp, Hp)),      # W_ih^T
                  const((Hp, Hp)),      # W_hh^T
                  const((1, Hp))],      # fused bias
        out_specs=pl.BlockSpec((t_chunk, Bp, Hp), lambda c: (c, 0, 0)),
        scratch_shapes=[pltpu.VMEM((Bp, Hp), jnp.float32)],
        compiler_params=pltpu.CompilerParams(
            dimension_semantics=("arbitrary",)),   # carried state => sequential
    )(x_seq, h0, prep["w_ih_t"], prep["w_hh_t"], prep["b_rnn"])

    # --- Decoder: one dense matmul over all (Tp*Bp) hidden rows, parallel tiles. ---
    rows = Tp * Bp
    tm = t_chunk * Bp                      # rows % tm == 0 by construction
    h_flat = h_seq.reshape(rows, Hp)
    logits_flat = pl.pallas_call(
        decoder_kernel,
        out_shape=jax.ShapeDtypeStruct((rows, Op), jnp.float32),
        grid=(rows // tm,),
        in_specs=[pl.BlockSpec((tm, Hp), lambda i: (i, 0)),
                  pl.BlockSpec((Hp, Op), lambda i: (0, 0)),
                  pl.BlockSpec((1, Op), lambda i: (0, 0))],
        out_specs=pl.BlockSpec((tm, Op), lambda i: (i, 0)),
        compiler_params=pltpu.CompilerParams(
            dimension_semantics=("parallel",)),
    )(h_flat, prep["w_dec_t"], prep["b_dec"])

    logits = logits_flat.reshape(Tp, Bp, Op)[:T, :B, :O]
    h_new = h_seq[T - 1, :B, :H].reshape(1, B, H)   # last real step == final hidden
    return logits, h_new


def charrnn_forward(tokens, hidden, prep):
    """Single-step forward matching CharRNN.forward: tokens (B,) -> (logits (B,O), hidden)."""
    logits, h_new = charrnn_forward_seq(tokens[None, :], hidden, prep)
    return logits[0], h_new


def init_params(key, input_size, hidden_size, output_size):
    ks = jax.random.split(key, 7)
    s = 1.0 / jnp.sqrt(hidden_size)
    return {
        "emb":   jax.random.normal(ks[0], (input_size, hidden_size), jnp.float32),
        "w_ih":  jax.random.uniform(ks[1], (hidden_size, hidden_size), jnp.float32, -s, s),
        "w_hh":  jax.random.uniform(ks[2], (hidden_size, hidden_size), jnp.float32, -s, s),
        "b_ih":  jax.random.uniform(ks[3], (hidden_size,), jnp.float32, -s, s),
        "b_hh":  jax.random.uniform(ks[4], (hidden_size,), jnp.float32, -s, s),
        "w_dec": jax.random.uniform(ks[5], (output_size, hidden_size), jnp.float32, -s, s),
        "b_dec": jax.random.uniform(ks[6], (output_size,), jnp.float32, -s, s),
    }


if __name__ == "__main__":
    # TODO(synk): only model='rnn' (n_layers=1) is implemented; the 'lstm' branch is not.
    input_size = 50     # vocab
    hidden_size = 32
    output_size = 50
    batch = 8
    seq_len = 12        # not a multiple of MAX_T_CHUNK -> exercises the padded-tail path

    key = jax.random.PRNGKey(0)
    kp, kt = jax.random.split(key)
    params = init_params(kp, input_size, hidden_size, output_size)
    prep = prepare_params(params)   # one-time transpose / fuse / pad

    tokens = jax.random.randint(kt, (seq_len, batch), 0, input_size, dtype=jnp.int32)
    hidden = jnp.zeros((1, batch, hidden_size), jnp.float32)   # init_hidden

    # Multi-step (sequence) call: the fast path for generation.
    logits_seq, h_final = charrnn_forward_seq(tokens, hidden, prep)
    jax.block_until_ready((logits_seq, h_final))

    # Single-step call matching CharRNN.forward exactly.
    logits_1, h_1 = charrnn_forward(tokens[0], hidden, prep)
    jax.block_until_ready((logits_1, h_1))

    # Reference in plain JAX (PyTorch math, unrolled over time).
    h_ref = hidden[0]
    logits_ref_list, h_ref_list = [], []
    for t in range(seq_len):
        enc = params["emb"][tokens[t]]
        h_ref = jnp.tanh(enc @ params["w_ih"].T + params["b_ih"]
                         + h_ref @ params["w_hh"].T + params["b_hh"])
        h_ref_list.append(h_ref)
        logits_ref_list.append(h_ref @ params["w_dec"].T + params["b_dec"])
    log_ref = jnp.stack(logits_ref_list, axis=0)

    assert jnp.allclose(logits_seq, log_ref, atol=1e-5), "seq logits mismatch"
    assert jnp.allclose(h_final[0], h_ref, atol=1e-5), "final hidden mismatch"
    assert jnp.allclose(logits_1, log_ref[0], atol=1e-5), "single-step logits mismatch"
    assert jnp.allclose(h_1[0], h_ref_list[0], atol=1e-5), "single-step hidden mismatch"
    assert logits_seq.shape == (seq_len, batch, output_size)
    assert h_final.shape == (1, batch, hidden_size)
    assert logits_1.shape == (batch, output_size)

    print("KERNEL_OK")
</pallas_src>

<mosaic_0001>
module attributes {stable_mosaic.version = 11 : i64} {
  func.func @rnn_chunk_kernel(%arg0: i32, %arg1: memref<8x8x128xf32, #tpu.memory_space<vmem>>, %arg2: memref<8x128xf32, #tpu.memory_space<vmem>>, %arg3: memref<128x128xf32, #tpu.memory_space<vmem>>, %arg4: memref<128x128xf32, #tpu.memory_space<vmem>>, %arg5: memref<1x128xf32, #tpu.memory_space<vmem>>, %arg6: memref<8x8x128xf32, #tpu.memory_space<vmem>>, %arg7: memref<8x128xf32, #tpu.memory_space<vmem>>) attributes {dimension_semantics = [#tpu.dimension_semantics<arbitrary>], iteration_bounds = array<i64: 2>, scalar_prefetch = 0 : i64, scratch_operands = 1 : i64, tpu.core_type = #tpu.core_type<tc>, window_params = [{transform_indices = @transform_0, window_bounds = array<i64: 8, 8, 128>}, {pipeline_mode = #tpu.pipeline_mode<synchronous>, transform_indices = @transform_1, window_bounds = array<i64: 8, 128>}, {pipeline_mode = #tpu.pipeline_mode<synchronous>, transform_indices = @transform_2, window_bounds = array<i64: 128, 128>}, {pipeline_mode = #tpu.pipeline_mode<synchronous>, transform_indices = @transform_3, window_bounds = array<i64: 128, 128>}, {pipeline_mode = #tpu.pipeline_mode<synchronous>, transform_indices = @transform_4, window_bounds = array<i64: 1, 128>}, {transform_indices = @transform_5, window_bounds = array<i64: 8, 8, 128>}]} {
    %c0_i32 = arith.constant 0 : i32
    %0 = arith.cmpi eq, %arg0, %c0_i32 : i32
    %1 = arith.extui %0 : i1 to i32
    %c0_i32_0 = arith.constant 0 : i32
    %2 = arith.cmpi ne, %1, %c0_i32_0 : i32
    scf.if %2 {
      %c0_58 = arith.constant 0 : index
      %c0_59 = arith.constant 0 : index
      %112 = vector.load %arg2[%c0_58, %c0_59] : memref<8x128xf32, #tpu.memory_space<vmem>>, vector<8x128xf32>
      %c0_60 = arith.constant 0 : index
      %c0_61 = arith.constant 0 : index
      %113 = vector.load %arg7[%c0_60, %c0_61] : memref<8x128xf32, #tpu.memory_space<vmem>>, vector<8x128xf32>
      tpu.vector_store %arg7[%c0_60, %c0_61], %112 {strides = array<i32>} : memref<8x128xf32, #tpu.memory_space<vmem>>, vector<8x128xf32>,
    } else {
    }
    %c0 = arith.constant 0 : index
    %c0_1 = arith.constant 0 : index
    %3 = vector.load %arg3[%c0, %c0_1] : memref<128x128xf32, #tpu.memory_space<vmem>>, vector<128x128xf32>
    %c0_2 = arith.constant 0 : index
    %c0_3 = arith.constant 0 : index
    %4 = vector.load %arg4[%c0_2, %c0_3] : memref<128x128xf32, #tpu.memory_space<vmem>>, vector<128x128xf32>
    %c0_4 = arith.constant 0 : index
    %c0_5 = arith.constant 0 : index
    %5 = vector.load %arg5[%c0_4, %c0_5] : memref<1x128xf32, #tpu.memory_space<vmem>>, vector<1x128xf32>
    %c0_6 = arith.constant 0 : index
    %c0_7 = arith.constant 0 : index
    %6 = vector.load %arg7[%c0_6, %c0_7] : memref<8x128xf32, #tpu.memory_space<vmem>>, vector<8x128xf32>
    %c0_i32_8 = arith.constant 0 : i32
    %7 = arith.index_cast %c0_i32_8 : i32 to index
    %c0_9 = arith.constant 0 : index
    %c0_10 = arith.constant 0 : index
    %8 = vector.load %arg1[%7, %c0_9, %c0_10] : memref<8x8x128xf32, #tpu.memory_space<vmem>>, vector<1x8x128xf32>
    %9 = vector.shape_cast %8 : vector<1x8x128xf32> to vector<8x128xf32>
    %cst = arith.constant dense<0.000000e+00> : vector<8x128xf32>
    %10 = tpu.matmul %9, %3, %cst {dimension_numbers = #tpu.dot_dimension_numbers<[1], [0], [0], [1], [0, 0, 1, 1], [], []>} : vector<8x128xf32>, vector<128x128xf32>, vector<8x128xf32> -> vector<8x128xf32>
    %cst_11 = arith.constant dense<0.000000e+00> : vector<8x128xf32>
    %11 = tpu.matmul %6, %4, %cst_11 {dimension_numbers = #tpu.dot_dimension_numbers<[1], [0], [0], [1], [0, 0, 1, 1], [], []>} : vector<8x128xf32>, vector<128x128xf32>, vector<8x128xf32> -> vector<8x128xf32>
    %12 = arith.addf %10, %11 : vector<8x128xf32>
    %13 = vector.broadcast %5 : vector<1x128xf32> to vector<8x128xf32>
    %14 = arith.addf %12, %13 : vector<8x128xf32>
    %15 = math.tanh %14 : vector<8x128xf32>
    %16 = arith.index_cast %c0_i32_8 : i32 to index
    %c0_12 = arith.constant 0 : index
    %c0_13 = arith.constant 0 : index
    %17 = vector.load %arg6[%16, %c0_12, %c0_13] : memref<8x8x128xf32, #tpu.memory_space<vmem>>, vector<1x8x128xf32>
    %18 = vector.shape_cast %17 : vector<1x8x128xf32> to vector<8x128xf32>
    %19 = vector.shape_cast %15 : vector<8x128xf32> to vector<1x8x128xf32>
    tpu.vector_store %arg6[%16, %c0_12, %c0_13], %19 {strides = array<i32>} : memref<8x8x128xf32, #tpu.memory_space<vmem>>, vector<1x8x128xf32>,
    %c1_i32 = arith.constant 1 : i32
    %20 = arith.index_cast %c1_i32 : i32 to index
    %c0_14 = arith.constant 0 : index
    %c0_15 = arith.constant 0 : index
    %21 = vector.load %arg1[%20, %c0_14, %c0_15] : memref<8x8x128xf32, #tpu.memory_space<vmem>>, vector<1x8x128xf32>
    %22 = vector.shape_cast %21 : vector<1x8x128xf32> to vector<8x128xf32>
    %cst_16 = arith.constant dense<0.000000e+00> : vector<8x128xf32>
    %23 = tpu.matmul %22, %3, %cst_16 {dimension_numbers = #tpu.dot_dimension_numbers<[1], [0], [0], [1], [0, 0, 1, 1], [], []>} : vector<8x128xf32>, vector<128x128xf32>, vector<8x128xf32> -> vector<8x128xf32>
    %cst_17 = arith.constant dense<0.000000e+00> : vector<8x128xf32>
    %24 = tpu.matmul %15, %4, %cst_17 {dimension_numbers = #tpu.dot_dimension_numbers<[1], [0], [0], [1], [0, 0, 1, 1], [], []>} : vector<8x128xf32>, vector<128x128xf32>, vector<8x128xf32> -> vector<8x128xf32>
    %25 = arith.addf %23, %24 : vector<8x128xf32>
    %26 = vector.broadcast %5 : vector<1x128xf32> to vector<8x128xf32>
    %27 = arith.addf %25, %26 : vector<8x128xf32>
    %28 = math.tanh %27 : vector<8x128xf32>
    %29 = arith.index_cast %c1_i32 : i32 to index
    %c0_18 = arith.constant 0 : index
    %c0_19 = arith.constant 0 : index
    %30 = vector.load %arg6[%29, %c0_18, %c0_19] : memref<8x8x128xf32, #tpu.memory_space<vmem>>, vector<1x8x128xf32>
    %31 = vector.shape_cast %30 : vector<1x8x128xf32> to vector<8x128xf32>
    %32 = vector.shape_cast %28 : vector<8x128xf32> to vector<1x8x128xf32>
    tpu.vector_store %arg6[%29, %c0_18, %c0_19], %32 {strides = array<i32>} : memref<8x8x128xf32, #tpu.memory_space<vmem>>, vector<1x8x128xf32>,
    %c2_i32 = arith.constant 2 : i32
    %33 = arith.index_cast %c2_i32 : i32 to index
    %c0_20 = arith.constant 0 : index
    %c0_21 = arith.constant 0 : index
    %34 = vector.load %arg1[%33, %c0_20, %c0_21] : memref<8x8x128xf32, #tpu.memory_space<vmem>>, vector<1x8x128xf32>
    %35 = vector.shape_cast %34 : vector<1x8x128xf32> to vector<8x128xf32>
    %cst_22 = arith.constant dense<0.000000e+00> : vector<8x128xf32>
    %36 = tpu.matmul %35, %3, %cst_22 {dimension_numbers = #tpu.dot_dimension_numbers<[1], [0], [0], [1], [0, 0, 1, 1], [], []>} : vector<8x128xf32>, vector<128x128xf32>, vector<8x128xf32> -> vector<8x128xf32>
    %cst_23 = arith.constant dense<0.000000e+00> : vector<8x128xf32>
    %37 = tpu.matmul %28, %4, %cst_23 {dimension_numbers = #tpu.dot_dimension_numbers<[1], [0], [0], [1], [0, 0, 1, 1], [], []>} : vector<8x128xf32>, vector<128x128xf32>, vector<8x128xf32> -> vector<8x128xf32>
    %38 = arith.addf %36, %37 : vector<8x128xf32>
    %39 = vector.broadcast %5 : vector<1x128xf32> to vector<8x128xf32>
    %40 = arith.addf %38, %39 : vector<8x128xf32>
    %41 = math.tanh %40 : vector<8x128xf32>
    %42 = arith.index_cast %c2_i32 : i32 to index
    %c0_24 = arith.constant 0 : index
    %c0_25 = arith.constant 0 : index
    %43 = vector.load %arg6[%42, %c0_24, %c0_25] : memref<8x8x128xf32, #tpu.memory_space<vmem>>, vector<1x8x128xf32>
    %44 = vector.shape_cast %43 : vector<1x8x128xf32> to vector<8x128xf32>
    %45 = vector.shape_cast %41 : vector<8x128xf32> to vector<1x8x128xf32>
    tpu.vector_store %arg6[%42, %c0_24, %c0_25], %45 {strides = array<i32>} : memref<8x8x128xf32, #tpu.memory_space<vmem>>, vector<1x8x128xf32>,
    %c3_i32 = arith.constant 3 : i32
    %46 = arith.index_cast %c3_i32 : i32 to index
    %c0_26 = arith.constant 0 : index
    %c0_27 = arith.constant 0 : index
    %47 = vector.load %arg1[%46, %c0_26, %c0_27] : memref<8x8x128xf32, #tpu.memory_space<vmem>>, vector<1x8x128xf32>
    %48 = vector.shape_cast %47 : vector<1x8x128xf32> to vector<8x128xf32>
    %cst_28 = arith.constant dense<0.000000e+00> : vector<8x128xf32>
    %49 = tpu.matmul %48, %3, %cst_28 {dimension_numbers = #tpu.dot_dimension_numbers<[1], [0], [0], [1], [0, 0, 1, 1], [], []>} : vector<8x128xf32>, vector<128x128xf32>, vector<8x128xf32> -> vector<8x128xf32>
    %cst_29 = arith.constant dense<0.000000e+00> : vector<8x128xf32>
    %50 = tpu.matmul %41, %4, %cst_29 {dimension_numbers = #tpu.dot_dimension_numbers<[1], [0], [0], [1], [0, 0, 1, 1], [], []>} : vector<8x128xf32>, vector<128x128xf32>, vector<8x128xf32> -> vector<8x128xf32>
    %51 = arith.addf %49, %50 : vector<8x128xf32>
    %52 = vector.broadcast %5 : vector<1x128xf32> to vector<8x128xf32>
    %53 = arith.addf %51, %52 : vector<8x128xf32>
    %54 = math.tanh %53 : vector<8x128xf32>
    %55 = arith.index_cast %c3_i32 : i32 to index
    %c0_30 = arith.constant 0 : index
    %c0_31 = arith.constant 0 : index
    %56 = vector.load %arg6[%55, %c0_30, %c0_31] : memref<8x8x128xf32, #tpu.memory_space<vmem>>, vector<1x8x128xf32>
    %57 = vector.shape_cast %56 : vector<1x8x128xf32> to vector<8x128xf32>
    %58 = vector.shape_cast %54 : vector<8x128xf32> to vector<1x8x128xf32>
    tpu.vector_store %arg6[%55, %c0_30, %c0_31], %58 {strides = array<i32>} : memref<8x8x128xf32, #tpu.memory_space<vmem>>, vector<1x8x128xf32>,
    %c4_i32 = arith.constant 4 : i32
    %59 = arith.index_cast %c4_i32 : i32 to index
    %c0_32 = arith.constant 0 : index
    %c0_33 = arith.constant 0 : index
    %60 = vector.load %arg1[%59, %c0_32, %c0_33] : memref<8x8x128xf32, #tpu.memory_space<vmem>>, vector<1x8x128xf32>
    %61 = vector.shape_cast %60 : vector<1x8x128xf32> to vector<8x128xf32>
    %cst_34 = arith.constant dense<0.000000e+00> : vector<8x128xf32>
    %62 = tpu.matmul %61, %3, %cst_34 {dimension_numbers = #tpu.dot_dimension_numbers<[1], [0], [0], [1], [0, 0, 1, 1], [], []>} : vector<8x128xf32>, vector<128x128xf32>, vector<8x128xf32> -> vector<8x128xf32>
    %cst_35 = arith.constant dense<0.000000e+00> : vector<8x128xf32>
    %63 = tpu.matmul %54, %4, %cst_35 {dimension_numbers = #tpu.dot_dimension_numbers<[1], [0], [0], [1], [0, 0, 1, 1], [], []>} : vector<8x128xf32>, vector<128x128xf32>, vector<8x128xf32> -> vector<8x128xf32>
    %64 = arith.addf %62, %63 : vector<8x128xf32>
    %65 = vector.broadcast %5 : vector<1x128xf32> to vector<8x128xf32>
    %66 = arith.addf %64, %65 : vector<8x128xf32>
    %67 = math.tanh %66 : vector<8x128xf32>
    %68 = arith.index_cast %c4_i32 : i32 to index
    %c0_36 = arith.constant 0 : index
    %c0_37 = arith.constant 0 : index
    %69 = vector.load %arg6[%68, %c0_36, %c0_37] : memref<8x8x128xf32, #tpu.memory_space<vmem>>, vector<1x8x128xf32>
    %70 = vector.shape_cast %69 : vector<1x8x128xf32> to vector<8x128xf32>
    %71 = vector.shape_cast %67 : vector<8x128xf32> to vector<1x8x128xf32>
    tpu.vector_store %arg6[%68, %c0_36, %c0_37], %71 {strides = array<i32>} : memref<8x8x128xf32, #tpu.memory_space<vmem>>, vector<1x8x128xf32>,
    %c5_i32 = arith.constant 5 : i32
    %72 = arith.index_cast %c5_i32 : i32 to index
    %c0_38 = arith.constant 0 : index
    %c0_39 = arith.constant 0 : index
    %73 = vector.load %arg1[%72, %c0_38, %c0_39] : memref<8x8x128xf32, #tpu.memory_space<vmem>>, vector<1x8x128xf32>
    %74 = vector.shape_cast %73 : vector<1x8x128xf32> to vector<8x128xf32>
    %cst_40 = arith.constant dense<0.000000e+00> : vector<8x128xf32>
    %75 = tpu.matmul %74, %3, %cst_40 {dimension_numbers = #tpu.dot_dimension_numbers<[1], [0], [0], [1], [0, 0, 1, 1], [], []>} : vector<8x128xf32>, vector<128x128xf32>, vector<8x128xf32> -> vector<8x128xf32>
    %cst_41 = arith.constant dense<0.000000e+00> : vector<8x128xf32>
    %76 = tpu.matmul %67, %4, %cst_41 {dimension_numbers = #tpu.dot_dimension_numbers<[1], [0], [0], [1], [0, 0, 1, 1], [], []>} : vector<8x128xf32>, vector<128x128xf32>, vector<8x128xf32> -> vector<8x128xf32>
    %77 = arith.addf %75, %76 : vector<8x128xf32>
    %78 = vector.broadcast %5 : vector<1x128xf32> to vector<8x128xf32>
    %79 = arith.addf %77, %78 : vector<8x128xf32>
    %80 = math.tanh %79 : vector<8x128xf32>
    %81 = arith.index_cast %c5_i32 : i32 to index
    %c0_42 = arith.constant 0 : index
    %c0_43 = arith.constant 0 : index
    %82 = vector.load %arg6[%81, %c0_42, %c0_43] : memref<8x8x128xf32, #tpu.memory_space<vmem>>, vector<1x8x128xf32>
    %83 = vector.shape_cast %82 : vector<1x8x128xf32> to vector<8x128xf32>
    %84 = vector.shape_cast %80 : vector<8x128xf32> to vector<1x8x128xf32>
    tpu.vector_store %arg6[%81, %c0_42, %c0_43], %84 {strides = array<i32>} : memref<8x8x128xf32, #tpu.memory_space<vmem>>, vector<1x8x128xf32>,
    %c6_i32 = arith.constant 6 : i32
    %85 = arith.index_cast %c6_i32 : i32 to index
    %c0_44 = arith.constant 0 : index
    %c0_45 = arith.constant 0 : index
    %86 = vector.load %arg1[%85, %c0_44, %c0_45] : memref<8x8x128xf32, #tpu.memory_space<vmem>>, vector<1x8x128xf32>
    %87 = vector.shape_cast %86 : vector<1x8x128xf32> to vector<8x128xf32>
    %cst_46 = arith.constant dense<0.000000e+00> : vector<8x128xf32>
    %88 = tpu.matmul %87, %3, %cst_46 {dimension_numbers = #tpu.dot_dimension_numbers<[1], [0], [0], [1], [0, 0, 1, 1], [], []>} : vector<8x128xf32>, vector<128x128xf32>, vector<8x128xf32> -> vector<8x128xf32>
    %cst_47 = arith.constant dense<0.000000e+00> : vector<8x128xf32>
    %89 = tpu.matmul %80, %4, %cst_47 {dimension_numbers = #tpu.dot_dimension_numbers<[1], [0], [0], [1], [0, 0, 1, 1], [], []>} : vector<8x128xf32>, vector<128x128xf32>, vector<8x128xf32> -> vector<8x128xf32>
    %90 = arith.addf %88, %89 : vector<8x128xf32>
    %91 = vector.broadcast %5 : vector<1x128xf32> to vector<8x128xf32>
    %92 = arith.addf %90, %91 : vector<8x128xf32>
    %93 = math.tanh %92 : vector<8x128xf32>
    %94 = arith.index_cast %c6_i32 : i32 to index
    %c0_48 = arith.constant 0 : index
    %c0_49 = arith.constant 0 : index
    %95 = vector.load %arg6[%94, %c0_48, %c0_49] : memref<8x8x128xf32, #tpu.memory_space<vmem>>, vector<1x8x128xf32>
    %96 = vector.shape_cast %95 : vector<1x8x128xf32> to vector<8x128xf32>
    %97 = vector.shape_cast %93 : vector<8x128xf32> to vector<1x8x128xf32>
    tpu.vector_store %arg6[%94, %c0_48, %c0_49], %97 {strides = array<i32>} : memref<8x8x128xf32, #tpu.memory_space<vmem>>, vector<1x8x128xf32>,
    %c7_i32 = arith.constant 7 : i32
    %98 = arith.index_cast %c7_i32 : i32 to index
    %c0_50 = arith.constant 0 : index
    %c0_51 = arith.constant 0 : index
    %99 = vector.load %arg1[%98, %c0_50, %c0_51] : memref<8x8x128xf32, #tpu.memory_space<vmem>>, vector<1x8x128xf32>
    %100 = vector.shape_cast %99 : vector<1x8x128xf32> to vector<8x128xf32>
    %cst_52 = arith.constant dense<0.000000e+00> : vector<8x128xf32>
    %101 = tpu.matmul %100, %3, %cst_52 {dimension_numbers = #tpu.dot_dimension_numbers<[1], [0], [0], [1], [0, 0, 1, 1], [], []>} : vector<8x128xf32>, vector<128x128xf32>, vector<8x128xf32> -> vector<8x128xf32>
    %cst_53 = arith.constant dense<0.000000e+00> : vector<8x128xf32>
    %102 = tpu.matmul %93, %4, %cst_53 {dimension_numbers = #tpu.dot_dimension_numbers<[1], [0], [0], [1], [0, 0, 1, 1], [], []>} : vector<8x128xf32>, vector<128x128xf32>, vector<8x128xf32> -> vector<8x128xf32>
    %103 = arith.addf %101, %102 : vector<8x128xf32>
    %104 = vector.broadcast %5 : vector<1x128xf32> to vector<8x128xf32>
    %105 = arith.addf %103, %104 : vector<8x128xf32>
    %106 = math.tanh %105 : vector<8x128xf32>
    %107 = arith.index_cast %c7_i32 : i32 to index
    %c0_54 = arith.constant 0 : index
    %c0_55 = arith.constant 0 : index
    %108 = vector.load %arg6[%107, %c0_54, %c0_55] : memref<8x8x128xf32, #tpu.memory_space<vmem>>, vector<1x8x128xf32>
    %109 = vector.shape_cast %108 : vector<1x8x128xf32> to vector<8x128xf32>
    %110 = vector.shape_cast %106 : vector<8x128xf32> to vector<1x8x128xf32>
    tpu.vector_store %arg6[%107, %c0_54, %c0_55], %110 {strides = array<i32>} : memref<8x8x128xf32, #tpu.memory_space<vmem>>, vector<1x8x128xf32>,
    %c8_i32 = arith.constant 8 : i32
    %c0_56 = arith.constant 0 : index
    %c0_57 = arith.constant 0 : index
    %111 = vector.load %arg7[%c0_56, %c0_57] : memref<8x128xf32, #tpu.memory_space<vmem>>, vector<8x128xf32>
    tpu.vector_store %arg7[%c0_56, %c0_57], %106 {strides = array<i32>} : memref<8x128xf32, #tpu.memory_space<vmem>>, vector<8x128xf32>,
    return
  }
  func.func @transform_0(%arg0: i32) -> (i32, i32, i32) {
    %c0_i32 = arith.constant 0 : i32
    %c0_i32_0 = arith.constant 0 : i32
    %c0_i32_1 = arith.constant 0 : i32
    return %arg0, %c0_i32, %c0_i32_0 : i32, i32, i32
  }
  func.func @transform_1(%arg0: i32) -> (i32, i32) {
    %c0_i32 = arith.constant 0 : i32
    %c0_i32_0 = arith.constant 0 : i32
    %c0_i32_1 = arith.constant 0 : i32
    return %c0_i32, %c0_i32_0 : i32, i32
  }
  func.func @transform_2(%arg0: i32) -> (i32, i32) {
    %c0_i32 = arith.constant 0 : i32
    %c0_i32_0 = arith.constant 0 : i32
    %c0_i32_1 = arith.constant 0 : i32
    return %c0_i32, %c0_i32_0 : i32, i32
  }
  func.func @transform_3(%arg0: i32) -> (i32, i32) {
    %c0_i32 = arith.constant 0 : i32
    %c0_i32_0 = arith.constant 0 : i32
    %c0_i32_1 = arith.constant 0 : i32
    return %c0_i32, %c0_i32_0 : i32, i32
  }
  func.func @transform_4(%arg0: i32) -> (i32, i32) {
    %c0_i32 = arith.constant 0 : i32
    %c0_i32_0 = arith.constant 0 : i32
    %c0_i32_1 = arith.constant 0 : i32
    return %c0_i32, %c0_i32_0 : i32, i32
  }
  func.func @transform_5(%arg0: i32) -> (i32, i32, i32) {
    %c0_i32 = arith.constant 0 : i32
    %c0_i32_0 = arith.constant 0 : i32
    %c0_i32_1 = arith.constant 0 : i32
    return %arg0, %c0_i32, %c0_i32_0 : i32, i32, i32
  }
}

</mosaic_0001>

<bundles_post_ra>
// kernel: tpu_custom_call.1
= control target key start
LH: loop header
LB: loop body
LE: loop exit
PB: predicated region body
PF: predicated region fallthrough
CT: control target
= control target key end

     0   :  { %10 = vsyncpa [#allocation4], 0  ;;  %s3820_s0 = inlined_call_operand.hbm [shape: f32[16,8,128], index: 0, kind: input, shape index: {}]   ;;  %s3821_s1 = inlined_call_operand.hbm [shape: f32[8,128], index: 1, kind: input, shape index: {}]   ;;  %s3822_s2 = inlined_call_operand.hbm [shape: f32[128,128], index: 2, kind: input, shape index: {}]   ;;  %s3823_s3 = inlined_call_operand.hbm [shape: f32[128,128], index: 3, kind: input, shape index: {}]   ;;  %s3824_s4 = inlined_call_operand.vmem [shape: f32[1,128], index: 4, kind: input, shape index: {}]   ;;  %s3825_s5 = inlined_call_operand.hbm [shape: f32[16,8,128], index: 5, kind: output, shape index: {}]  }
   0x1   :  { %12 = vsyncpa [#allocation4 + $0x1], 0 }
   0x2   :  { %13 = vsyncpa [#allocation7], 0 }
   0x3   :  { %14 = vsyncpa [#allocation10], 0 }
   0x4   :  { %15 = vsyncpa [#allocation5], 0 }
   0x5   :  { %17 = vsyncpa [#allocation5 + $0x1], 0  ;;  %s3202_s18 = smov 0   ;;  %s3204_s19 = smov 0  }
   0x6   :  { %s3206_s20 = smov 0   ;;  %s3208_s21 = smov 0  }
   0x7 LB: > { %s3223_s22 = sadd.s32 4294967295, %s3158_s21   ;;  %s1616_s23 = sadd.s32 4294967294, %s3158_s21   ;;  %s3158_s21 = sphi %s3208_s21, %s3849_s21   ;;  %s3154_s20 = sphi %s3206_s20, %s3848_s20   ;;  %s3150_s19 = sphi %s3204_s19, %s3847_s19   ;;  %s3146_s18 = sphi %s3202_s18, %s3846_s18  }
   0x8   : > { %p43_p0 = scmp.ne.s32.totalorder %s3150_s19, %s3146_s18  ;;  %p3826_p1 = scmp.eq.s32.totalorder %s3223_s22, 0 }
   0x9   : > { %p157_p3 = scmp.eq.s32.totalorder %s1616_s23, 1  ;;  %p1617_p5 = scmp.ge.s32.totalorder %s3158_s21, 1 }
   0xa   : > { %p3232_p4 = por %p3826_p1, %p43_p0  ;;  %p164_p7 = scmp.lt.s32.totalorder %s3158_s21, 3 }
   0xb   : > { %p3237_p6 = por %p157_p3, %p43_p0  ;;  %s3160_s27 = smov [#allocation6]  }
   0xc   : > { %s3829_s24 = scalar_select %p3232_p4, 1, 0 }
   0xd   : > { %s3830_s25 = scalar_select %p3237_p6, 1, 0 }
   0xe   : > { %p3243_p9 = pnand %p1617_p5, %p164_p7  ;;  %s177_s28 = sshll.u32 %s3160_s27, 4  ;;  %s178_s28 = int_to_ptr.vmem [resolvable:$true] %s177_s28 }
   0xf   : > { %s3161_s29 = smov [#allocation8]   ;;  %s3162_s7 = smov [#allocation9]  }
  0x10   : > { %s3831_s26 = scalar_select %p3243_p9, 1, 0 }
  0x11   : > { %p2886_p11 = pneg %p3243_p9  ;;  %s187_s30 = sshll.u32 %s3161_s29, 4  ;;  %s3256_s30 = int_to_ptr.vmem [resolvable:$true] %s187_s30 }
  0x12   : > { %s3258_s8 = sshll.u32 %s3162_s7, 4  ;;  %s2970_s11 = scalar_lea.hbm %s3821_s1, 128  ;;  %s201_s8 = int_to_ptr.vmem [resolvable:$true] %s3258_s8 }
  0x13   : > { %p3252_p12 = pnand %p2886_p11, %p3826_p1  ;;  %p2971_p13 = scmp.ne.s32.totalorder %s3821_s1, %s2970_s11 }
  0x14   : > { %p2977_p7 = scmp.lt.u32.totalorder %s2970_s11, %s3821_s1 }
  0x15   : > { %p3268_p0 = pneg %p3252_p12 }
  0x17   : > { %p2973_p3 = pnand %p3268_p0, %p2971_p13 }
  0x19   : > { %p2974_p5 = pneg %p2973_p3 }
  0x1b   : > { %p2979_p11 = pnand %p2977_p7, %p2974_p5 }
  0x1d   : > { %2982 = shalt.err (!%p2979_p11)
}
  0x1e   : > { %s2983_s17 = scalar_lea.vmem %s178_s28, 128  ;;  %p2991_p2 = scmp.lt.s32.totalorder %s178_s28, %s178_s28 }
  0x1f   : > { %p2984_p10 = scmp.ne.s32.totalorder %s178_s28, %s2983_s17  ;;  %p2992_p6 = scmp.lt.s32.totalorder %s2983_s17, %s2983_s17 }
  0x21   : > { %p2986_p8 = pnand %p2984_p10, %p3268_p0  ;;  %p2993_p4 = por %p2992_p6, %p2991_p2 }
  0x23   : > { %p2987_p1 = pneg %p2986_p8 }
  0x25   : > { %p2994_p9 = pnand %p2993_p4, %p2987_p1 }
  0x27   : > { %2997 = shalt.err (!%p2994_p9)
}
  0x28   : > { %2889 = dma.hbm_to_vmem [thread:$0]  (!%p3252_p12), %s3821_s1, 128, %s178_s28, [#allocation7]  }
  0x29   : > { %s2998_s9 = scalar_lea.hbm %s3822_s2, 2048 }
  0x2a   : > { %p2999_p8 = scmp.ne.s32.totalorder %s3822_s2, %s2998_s9  ;;  %p3005_p1 = scmp.lt.u32.totalorder %s2998_s9, %s3822_s2 }
  0x2c   : > { %p3001_p10 = pnand %p2999_p8, %p3268_p0 }
  0x2e   : > { %p3002_p2 = pneg %p3001_p10 }
  0x30   : > { %p3007_p4 = pnand %p3005_p1, %p3002_p2 }
  0x32   : > { %3010 = shalt.err (!%p3007_p4)
}
  0x33   : > { %s3011_s28 = scalar_lea.vmem %s3256_s30, 2048  ;;  %p3019_p3 = scmp.lt.s32.totalorder %s3256_s30, %s3256_s30 }
  0x34   : > { %p3012_p6 = scmp.ne.s32.totalorder %s3256_s30, %s3011_s28  ;;  %p3020_p5 = scmp.lt.s32.totalorder %s3011_s28, %s3011_s28 }
  0x36   : > { %p3014_p9 = pnand %p3012_p6, %p3268_p0  ;;  %p3021_p7 = por %p3020_p5, %p3019_p3 }
  0x38   : > { %p3015_p13 = pneg %p3014_p9 }
  0x3a   : > { %p3022_p11 = pnand %p3021_p7, %p3015_p13 }
  0x3c   : > { %3025 = shalt.err (!%p3022_p11)
}
  0x3d   : > { %s3163_s15 = smov 128   ;;  %s3164_s16 = smov 8  }
  0x3e   : > { %2892 = dma.hbm_to_vmem [thread:$0]  (!%p3252_p12), %s3822_s2, 2048, %s3256_s30, [#allocation7], %s3163_s15, %s3163_s15, %s3164_s16  }
  0x3f   : > { %s3026_s7 = scalar_lea.hbm %s3823_s3, 2048 }
  0x40   : > { %p3027_p8 = scmp.ne.s32.totalorder %s3823_s3, %s3026_s7  ;;  %p3033_p1 = scmp.lt.u32.totalorder %s3026_s7, %s3823_s3 }
  0x42   : > { %p3029_p10 = pnand %p3027_p8, %p3268_p0 }
  0x44   : > { %p3030_p2 = pneg %p3029_p10 }
  0x46   : > { %p3035_p4 = pnand %p3033_p1, %p3030_p2 }
  0x48   : > { %3038 = shalt.err (!%p3035_p4)
}
  0x49   : > { %s3039_s13 = scalar_lea.vmem %s201_s8, 2048  ;;  %p3047_p3 = scmp.lt.s32.totalorder %s201_s8, %s201_s8 }
  0x4a   : > { %p3040_p6 = scmp.ne.s32.totalorder %s201_s8, %s3039_s13  ;;  %p3048_p5 = scmp.lt.s32.totalorder %s3039_s13, %s3039_s13 }
  0x4c   : > { %p3042_p9 = pnand %p3040_p6, %p3268_p0  ;;  %p3049_p7 = por %p3048_p5, %p3047_p3 }
  0x4e   : > { %p3043_p13 = pneg %p3042_p9 }
  0x50   : > { %p3050_p11 = pnand %p3049_p7, %p3043_p13 }
  0x52   : > { %3053 = shalt.err (!%p3050_p11)
}
  0x53   : > { %2895 = dma.hbm_to_vmem [thread:$0]  (!%p3252_p12), %s3823_s3, 2048, %s201_s8, [#allocation10], %s3163_s15, %s3163_s15, %s3164_s16  }
  0x54   : > { %s3333_s14 = sadd.s32 1, %s3158_s21   ;;  %s30_s17 = sadd.s32 1, %s3154_s20 }
  0x55   : > { %s27_s6 = ssub.s32 %s3158_s21, %s3333_s14  ;;  %p37_p8 = scmp.ne.s32.totalorder %s3154_s20, %s3150_s19 }
  0x56   : > { %p28_p0 = scmp.eq.s32.totalorder %s27_s6, 0  ;;  %p38_p10 = scmp.eq.s32.totalorder %s3158_s21, 0 }
  0x57   : > { %p2907_p2 = scmp.lt.s32.totalorder %s3158_s21, 2  ;;  %p3834_p4 = scmp.eq.s32.totalorder %s3223_s22, 1 }
  0x58   : > { %s3343_s23 = scalar_select %p28_p0, %s3154_s20, %s30_s17  }
  0x59   : > { %p39_p1 = por %p38_p10, %p37_p8  ;;  %p3347_p6 = por %p3834_p4, %p37_p8 }
  0x5a   : > { %s217_s29 = sand.u32 1, %s3154_s20   ;;  %s1652_s7 = sshll.u32 %s3158_s21, 10 }
  0x5b   : > { %s1622_s8 = sshll.u32 %s217_s29, 6  ;;  %s3356_s11 = scalar_lea.hbm %s3820_s0, %s1652_s7 }
  0x5c   : > { %s221_s12 = scalar_lea.vmem [#allocation3], %s1622_s8  ;;  %p3358_p12 = pnand %p2907_p2, %p39_p1 }
  0x5d   : > { %s228_s13 = sshll.u32 %s221_s12, 4  ;;  %s3364_s28 = scalar_lea.sflag [#allocation4], %s217_s29  ;;  %s3362_s13 = int_to_ptr.vmem [resolvable:$true] %s228_s13 }
  0x5e   : > { %s3054_s6 = scalar_lea.hbm %s3356_s11, 1024  ;;  %p3056_p13 = pneg %p3358_p12 }
  0x5f   : > { %p3055_p9 = scmp.ne.s32.totalorder %s3356_s11, %s3054_s6  ;;  %s3059_s8 = scalar_lea.hbm %s3820_s0, 2048 }
  0x60   : > { %p3060_p7 = scmp.lt.u32.totalorder %s3356_s11, %s3820_s0  ;;  %p3061_p11 = scmp.lt.u32.totalorder %s3059_s8, %s3054_s6 }
  0x61   : > { %p3057_p3 = pnand %p3056_p13, %p3055_p9  ;;  %p3063_p8 = scmp.lt.u32.totalorder %s3054_s6, %s3356_s11 }
  0x62   : > { %p3062_p0 = por %p3061_p11, %p3060_p7 }
  0x63   : > { %p3058_p5 = pneg %p3057_p3 }
  0x64   : > { %p3064_p10 = por %p3063_p8, %p3062_p0 }
  0x66   : > { %p3065_p2 = pnand %p3064_p10, %p3058_p5 }
  0x68   : > { %3068 = shalt.err (!%p3065_p2)
}
  0x69   : > { %s3069_s29 = scalar_lea.vmem %s3362_s13, 1024  ;;  %s3165_s12 = smov [#allocation3]  }
  0x6a   : > { %p3070_p1 = scmp.ne.s32.totalorder %s3362_s13, %s3069_s29  ;;  %s3074_s17 = sshll.u32 %s3165_s12, 4  ;;  %s3075_s17 = int_to_ptr.vmem [resolvable:$false] %s3074_s17 }
  0x6b   : > { %s3076_s7 = scalar_lea.vmem %s3075_s17, 2048  ;;  %p3077_p3 = scmp.lt.s32.totalorder %s3362_s13, %s3075_s17 }
  0x6c   : > { %p3072_p4 = pnand %p3070_p1, %p3056_p13  ;;  %p3078_p7 = scmp.lt.s32.totalorder %s3076_s7, %s3069_s29 }
  0x6e   : > { %p3073_p9 = pneg %p3072_p4  ;;  %p3079_p11 = por %p3078_p7, %p3077_p3 }
  0x70   : > { %p3080_p0 = pnand %p3079_p11, %p3073_p9 }
  0x72   : > { %3083 = shalt.err (!%p3080_p0)
}
  0x73   : > { %2899 = dma.hbm_to_vmem [thread:$0]  (!%p3358_p12), %s3356_s11, 1024, %s3362_s13, %s3364_s28, %s3163_s15, %s3163_s15, %s3164_s16  }
  0x74   : > { %p3837_p13 = scmp.ne.s32.totalorder %s3831_s26, 0 }
  0x75   : > { %s3398_s6 = sand.u32 (!%p3837_p13), 1, %s3150_s19   ;;  %p3838_p5 = scmp.ne.s32.totalorder (!%p3837_p13), %s3829_s24, 0 }
  0x76   : > { %240 = sbr.rel (%p3837_p13) target bundleno = 2008 (0x7d8), region = 40  ;;  %s1626_s8 = sshll.u32 (!%p3837_p13), %s3398_s6, 6 }
  0x77   : > { %s243_s9 = scalar_lea.sflag (!%p3837_p13), [#allocation4], %s3398_s6  ;;  %s3402_s10 = scalar_lea.vmem (!%p3837_p13), [#allocation3], %s1626_s8 }
  0x7d   : > { %3129 = dma.done.wait (%p3838_p5), %s243_s9, 1024  }
  0x7e   : > { %3131 = vsyncadd (%p3838_p5), %s243_s9, 4294966272  ;;  %p3839_p12 = scmp.eq.s32.totalorder %s3223_s22, 0 }
  0x80   : > { %3133 = dma.done.wait (%p3839_p12), [#allocation7], 2176   ;;  %p3840_p8 = pmov %p3839_p12 }
  0x82   : > { %3135 = vsyncadd (%p3840_p8), [#allocation7], 4294965120  ;;  %p3841_p10 = pmov %p3840_p8 }
  0x83   : > { %p3842_p2 = pmov %p3840_p8 }
  0x84   : > { %3137 = dma.done.wait (%p3841_p10), [#allocation10], 2048  }
  0x85   : > { %3139 = vsyncadd (%p3842_p2), [#allocation10], 4294965248  ;;  %s3416_s26 = scalar_lea.vmem [#allocation11], %s1626_s8  ;;  %p3843_p1 = scmp.ne.s32.totalorder %s3223_s22, 0 }
  0x86   : > { %v291_v0 = vld [vmem:[#allocation6] sm:$0xff] (!%p3843_p1) }
  0x87   : > { %290 = sbr.rel (%p3843_p1) target bundleno = 142 (0x8e), region = 60  ;;  %292 = vst [vmem:[#allocation2] sm:$0xff] (!%p3843_p1), %v291_v0 }
  0x8e PF: > { %v309_v1 = vld [vmem:[#allocation9] sm:$0xff]  ;;  %v310_v2 = vld [vmem:[#allocation9 + $0x8] sm:$0xff]  ;;  %v3166_v4 = vmov 0.0|0.0   ;;  %v311_v7 = vld [vmem:[#allocation9 + $0x10] sm:$0xff]  ;;  %vm3167_vm0 = vmmov 0   ;;  %v3168_v12 = vmov 0.0  }
  0x8f   : > { %v293_v3 = vld [vmem:[#allocation8] sm:$0xff]  ;;  %2486 = vmatprep.subr.bf16.mxu0 %v3166_v4  ;;  %2510 = vmatprep.subr.bf16.mxu1 %v3166_v4  ;;  %v3422_v5 = vpack.c.bf16 %v310_v2, %v309_v1  ;;  %v294_v6 = vld [vmem:[#allocation8 + $0x8] sm:$0xff]  ;;  %v312_v8 = vld [vmem:[#allocation9 + $0x18] sm:$0xff]  ;;  %s1653_s16 = sshll.u32 %s3223_s22, 10  ;;  %s1514_s11 = sshll.u32 %s3416_s26, 4  ;;  %s3775_s11 = int_to_ptr.vmem [resolvable:$true] %s1514_s11 }
  0x90   : > { %v3424_v9 = vpack.c.bf16 %v294_v6, %v293_v3  ;;  %v295_v10 = vld [vmem:[#allocation8 + $0x10] sm:$0xff]  ;;  %v296_v11 = vld [vmem:[#allocation8 + $0x18] sm:$0xff]  ;;  %1958 = vmatprep.mubr.msk.f32.mxu0 %vm3167_vm0, %v3168_v12  ;;  %1993 = vmatprep.mubr.msk.f32.mxu1 %vm3167_vm0, %v3168_v12  ;;  %v3431_v13 = vpack.c.bf16 %v312_v8, %v311_v7  ;;  %v313_v15 = vld [vmem:[#allocation9 + $0x20] sm:$0xff]  ;;  %s3773_s28 = scalar_lea.hbm %s3825_s5, %s1653_s16  ;;  %s1501_s29 = scalar_lea.sflag [#allocation5], %s3398_s6 }
  0x91   : > { %2488 = vmatpush3.bf16.msra.mxu0 %v3422_v5  ;;  %v3435_v14 = vpack.c.bf16 %v296_v11, %v295_v10  ;;  %v314_v16 = vld [vmem:[#allocation9 + $0x28] sm:$0xff]  ;;  %v297_v17 = vld [vmem:[#allocation8 + $0x20] sm:$0xff]  ;;  %v315_v21 = vld [vmem:[#allocation9 + $0x30] sm:$0xff]  ;;  %s3084_s12 = scalar_lea.vmem %s3775_s11, 1024  ;;  %s3169_s22 = smov [#allocation11]  }
  0x92   : > { %2512 = vmatpush3.bf16.msra.mxu1 %v3424_v9  ;;  %2489 = vmatprep.subr.bf16.mxu0 %v3166_v4  ;;  %v298_v18 = vld [vmem:[#allocation8 + $0x28] sm:$0xff]  ;;  %v3439_v19 = vpack.c.bf16 %v314_v16, %v313_v15  ;;  %v316_v22 = vld [vmem:[#allocation9 + $0x38] sm:$0xff]  ;;  %v299_v23 = vld [vmem:[#allocation8 + $0x30] sm:$0xff]  ;;  %p3085_p4 = scmp.ne.s32.totalorder %s3775_s11, %s3084_s12  ;;  %s3088_s17 = sshll.u32 %s3169_s22, 4  ;;  %s3089_s17 = int_to_ptr.vmem [resolvable:$false] %s3088_s17 }
  0x93   : > { %2513 = vmatprep.subr.bf16.mxu1 %v3166_v4  ;;  %v3443_v20 = vpack.c.bf16 %v298_v18, %v297_v17  ;;  %v300_v24 = vld [vmem:[#allocation8 + $0x38] sm:$0xff]  ;;  %v3447_v25 = vpack.c.bf16 %v316_v22, %v315_v21  ;;  %v317_v27 = vld [vmem:[#allocation9 + $0x40] sm:$0xff]  ;;  %v318_v28 = vld [vmem:[#allocation9 + $0x48] sm:$0xff]  ;;  %s3090_s7 = scalar_lea.vmem %s3089_s17, 2048  ;;  %p3091_p7 = scmp.lt.s32.totalorder %s3775_s11, %s3089_s17 }
  0x94   : > { %v3451_v26 = vpack.c.bf16 %v300_v24, %v299_v23  ;;  %v301_v29 = vld [vmem:[#allocation8 + $0x40] sm:$0xff]  ;;  %v302_v30 = vld [vmem:[#allocation8 + $0x48] sm:$0xff]  ;;  %v3455_v31 = vpack.c.bf16 %v318_v28, %v317_v27  ;;  %v319_v33 = vld [vmem:[#allocation9 + $0x50] sm:$0xff]  ;;  %p3086_p9 = pnand %p3085_p4, %p3347_p6  ;;  %p3092_p11 = scmp.lt.s32.totalorder %s3090_s7, %s3084_s12 }
  0x95   : > { %2491 = vmatpush3.bf16.msra.mxu0 %v3431_v13  ;;  %v3459_v32 = vpack.c.bf16 %v302_v30, %v301_v29  ;;  %v320_v34 = vld [vmem:[#allocation9 + $0x58] sm:$0xff]  ;;  %v303_v35 = vld [vmem:[#allocation8 + $0x50] sm:$0xff]  ;;  %v321_v39 = vld [vmem:[#allocation9 + $0x60] sm:$0xff] }
  0x96   : > { %2515 = vmatpush3.bf16.msra.mxu1 %v3435_v14  ;;  %2492 = vmatprep.subr.bf16.mxu0 %v3166_v4  ;;  %v304_v36 = vld [vmem:[#allocation8 + $0x58] sm:$0xff]  ;;  %v3463_v37 = vpack.c.bf16 %v320_v34, %v319_v33  ;;  %v322_v40 = vld [vmem:[#allocation9 + $0x68] sm:$0xff]  ;;  %v305_v41 = vld [vmem:[#allocation8 + $0x60] sm:$0xff]  ;;  %p3087_p3 = pneg %p3086_p9  ;;  %p3093_p0 = por %p3092_p11, %p3091_p7 }
  0x97   : > { %2516 = vmatprep.subr.bf16.mxu1 %v3166_v4  ;;  %v3467_v38 = vpack.c.bf16 %v304_v36, %v303_v35  ;;  %v306_v42 = vld [vmem:[#allocation8 + $0x68] sm:$0xff]  ;;  %v3471_v43 = vpack.c.bf16 %v322_v40, %v321_v39  ;;  %v323_v45 = vld [vmem:[#allocation9 + $0x70] sm:$0xff]  ;;  %v324_v46 = vld [vmem:[#allocation9 + $0x78] sm:$0xff] }
  0x98   : > { %v3475_v44 = vpack.c.bf16 %v306_v42, %v305_v41  ;;  %v307_v47 = vld [vmem:[#allocation8 + $0x70] sm:$0xff]  ;;  %v308_v48 = vld [vmem:[#allocation8 + $0x78] sm:$0xff]  ;;  %v3479_v49 = vpack.c.bf16 %v324_v46, %v323_v45  ;;  %v1633_v53 = vld [vmem:[%s3402_s10 + $0x8] sm:$0xff]  ;;  %p3094_p13 = pnand %p3093_p0, %p3087_p3 }
  0x99   : > { %2494 = vmatpush3.bf16.msra.mxu0 %v3439_v19  ;;  %v3483_v50 = vpack.c.bf16 %v308_v48, %v307_v47  ;;  %v326_v51 = vld [vmem:[#allocation2] sm:$0xff]  ;;  %v327_v52 = vld [vmem:[%s3402_s10] sm:$0xff]  ;;  %v1635_v0 = vld [vmem:[%s3402_s10 + $0x10] sm:$0xff] }
  0x9a   : > { %2518 = vmatpush3.bf16.msra.mxu1 %v3443_v20  ;;  %2495 = vmatprep.subr.bf16.mxu0 %v3166_v4  ;;  %v3549_v55 = vld [vmem:[%s3824_s4] ss:$0 sm:$0xff]  ;;  %v1639_v24 = vld [vmem:[%s3402_s10 + $0x20] sm:$0xff]  ;;  %v1641_v36 = vld [vmem:[%s3402_s10 + $0x28] sm:$0xff] }
  0x9b   : > { %2519 = vmatprep.subr.bf16.mxu1 %v3166_v4  ;;  %v1637_v11 = vld [vmem:[%s3402_s10 + $0x18] sm:$0xff]  ;;  %v1643_v48 = vld [vmem:[%s3402_s10 + $0x30] sm:$0xff] }
  0x9d   : > { %2497 = vmatpush3.bf16.msra.mxu0 %v3447_v25 }
  0x9e   : > { %2521 = vmatpush3.bf16.msra.mxu1 %v3451_v26  ;;  %2498 = vmatprep.subr.bf16.mxu0 %v3166_v4 }
  0x9f   : > { %2522 = vmatprep.subr.bf16.mxu1 %v3166_v4 }
  0xa1   : > { %2500 = vmatpush3.bf16.msra.mxu0 %v3455_v31 }
  0xa2   : > { %2524 = vmatpush3.bf16.msra.mxu1 %v3459_v32  ;;  %2501 = vmatprep.subr.bf16.mxu0 %v3166_v4 }
  0xa3   : > { %2525 = vmatprep.subr.bf16.mxu1 %v3166_v4 }
  0xa5   : > { %2503 = vmatpush3.bf16.msra.mxu0 %v3463_v37 }
  0xa6   : > { %2527 = vmatpush3.bf16.msra.mxu1 %v3467_v38  ;;  %2504 = vmatprep.subr.bf16.mxu0 %v3166_v4 }
  0xa7   : > { %2528 = vmatprep.subr.bf16.mxu1 %v3166_v4 }
  0xa9   : > { %2506 = vmatpush3.bf16.msra.mxu0 %v3471_v43 }
  0xaa   : > { %2530 = vmatpush3.bf16.msra.mxu1 %v3475_v44  ;;  %2507 = vmatprep.subr.bf16.mxu0 %v3166_v4 }
  0xab   : > { %2531 = vmatprep.subr.bf16.mxu1 %v3166_v4 }
  0xad   : > { %2509 = vmatpush3.bf16.msra.mxu0 %v3479_v49 }
  0xae   : > { %2533 = vmatpush3.bf16.msra.mxu1 %v3483_v50  ;;  %2534 = vmatprep.subr.bf16.mxu0 %v3166_v4 }
  0xaf   : > { %2558 = vmatprep.subr.bf16.mxu1 %v3166_v4 }
  0xb0   : > { %1959 = vmatmul.mubr.f32.vlgmr.msra.gmra.mrb[0].mxu0 %v326_v51 }
  0xb1   : > { %1994 = vmatmul.mubr.f32.vlgmr.msra.gmra.mrb[0].mxu1 %v327_v52  ;;  %2536 = vmatpush3.bf16.msra.mxu0 %v3422_v5 }
  0xb2   : > { %2560 = vmatpush3.bf16.msra.mxu1 %v3424_v9  ;;  %2537 = vmatprep.subr.bf16.mxu0 %v3166_v4 }
  0xb3   : > { %2561 = vmatprep.subr.bf16.mxu1 %v3166_v4  ;;  %2063 = vmatprep.mubr.msk.f32.mxu1 %vm3167_vm0, %v3168_v12 }
  0xb4   : > { %2028 = vmatprep.mubr.msk.f32.mxu0 %vm3167_vm0, %v3168_v12 }
  0xb5   : > { %2539 = vmatpush3.bf16.msra.mxu0 %v3431_v13 }
  0xb6   : > { %2563 = vmatpush3.bf16.msra.mxu1 %v3435_v14  ;;  %2540 = vmatprep.subr.bf16.mxu0 %v3166_v4 }
  0xb7   : > { %2564 = vmatprep.subr.bf16.mxu1 %v3166_v4 }
  0xb9   : > { %2542 = vmatpush3.bf16.msra.mxu0 %v3439_v19 }
  0xba   : > { %2566 = vmatpush3.bf16.msra.mxu1 %v3443_v20  ;;  %2543 = vmatprep.subr.bf16.mxu0 %v3166_v4 }
  0xbb   : > { %2567 = vmatprep.subr.bf16.mxu1 %v3166_v4 }
  0xbd   : > { %2545 = vmatpush3.bf16.msra.mxu0 %v3447_v25 }
  0xbe   : > { %2569 = vmatpush3.bf16.msra.mxu1 %v3451_v26  ;;  %2546 = vmatprep.subr.bf16.mxu0 %v3166_v4 }
  0xbf   : > { %2570 = vmatprep.subr.bf16.mxu1 %v3166_v4 }
  0xc1   : > { %2548 = vmatpush3.bf16.msra.mxu0 %v3455_v31 }
  0xc2   : > { %2572 = vmatpush3.bf16.msra.mxu1 %v3459_v32  ;;  %2549 = vmatprep.subr.bf16.mxu0 %v3166_v4 }
  0xc3   : > { %2573 = vmatprep.subr.bf16.mxu1 %v3166_v4 }
  0xc5   : > { %2551 = vmatpush3.bf16.msra.mxu0 %v3463_v37 }
  0xc6   : > { %2575 = vmatpush3.bf16.msra.mxu1 %v3467_v38  ;;  %2552 = vmatprep.subr.bf16.mxu0 %v3166_v4 }
  0xc7   : > { %2576 = vmatprep.subr.bf16.mxu1 %v3166_v4 }
  0xc9   : > { %2554 = vmatpush3.bf16.msra.mxu0 %v3471_v43 }
  0xca   : > { %2578 = vmatpush3.bf16.msra.mxu1 %v3475_v44  ;;  %2555 = vmatprep.subr.bf16.mxu0 %v3166_v4 }
  0xcb   : > { %2579 = vmatprep.subr.bf16.mxu1 %v3166_v4 }
  0xcd   : > { %2557 = vmatpush3.bf16.msra.mxu0 %v3479_v49 }
  0xce   : > { %2581 = vmatpush3.bf16.msra.mxu1 %v3483_v50  ;;  %2582 = vmatprep.subr.bf16.mxu0 %v3166_v4 }
  0xcf   : > { %2606 = vmatprep.subr.bf16.mxu1 %v3166_v4 }
  0xd1   : > { %2064 = vmatmul.mubr.f32.vlgmr.msra.gmra.mrb[2].mxu1 %v1633_v53 }
  0xd2   : > { %2608 = vmatpush3.bf16.msra.mxu1 %v3424_v9  ;;  %2133 = vmatprep.mubr.msk.f32.mxu1 %vm3167_vm0, %v3168_v12 }
  0xd3   : > { %2609 = vmatprep.subr.bf16.mxu1 %v3166_v4 }
  0xd6   : > { %2611 = vmatpush3.bf16.msra.mxu1 %v3435_v14 }
  0xd7   : > { %2612 = vmatprep.subr.bf16.mxu1 %v3166_v4 }
  0xda   : > { %2614 = vmatpush3.bf16.msra.mxu1 %v3443_v20 }
  0xdb   : > { %2615 = vmatprep.subr.bf16.mxu1 %v3166_v4 }
  0xde   : > { %2617 = vmatpush3.bf16.msra.mxu1 %v3451_v26 }
  0xdf   : > { %2618 = vmatprep.subr.bf16.mxu1 %v3166_v4 }
  0xe2   : > { %2620 = vmatpush3.bf16.msra.mxu1 %v3459_v32 }
  0xe3   : > { %2621 = vmatprep.subr.bf16.mxu1 %v3166_v4 }
  0xe6   : > { %2623 = vmatpush3.bf16.msra.mxu1 %v3467_v38 }
  0xe7   : > { %2624 = vmatprep.subr.bf16.mxu1 %v3166_v4 }
  0xea   : > { %2626 = vmatpush3.bf16.msra.mxu1 %v3475_v44 }
  0xeb   : > { %2627 = vmatprep.subr.bf16.mxu1 %v3166_v4 }
  0xee   : > { %2629 = vmatpush3.bf16.msra.mxu1 %v3483_v50 }
  0xef   : > { %2654 = vmatprep.subr.bf16.mxu1 %v3166_v4 }
  0xf1   : > { %2134 = vmatmul.mubr.f32.vlgmr.msra.gmra.mrb[4].mxu1 %v1635_v0 }
  0xf2   : > { %2656 = vmatpush3.bf16.msra.mxu1 %v3424_v9  ;;  %2203 = vmatprep.mubr.msk.f32.mxu1 %vm3167_vm0, %v3168_v12 }
  0xf3   : > { %2657 = vmatprep.subr.bf16.mxu1 %v3166_v4 }
  0xf6   : > { %2659 = vmatpush3.bf16.msra.mxu1 %v3435_v14 }
  0xf7   : > { %2660 = vmatprep.subr.bf16.mxu1 %v3166_v4 }
  0xfa   : > { %2662 = vmatpush3.bf16.msra.mxu1 %v3443_v20 }
  0xfb   : > { %2663 = vmatprep.subr.bf16.mxu1 %v3166_v4 }
  0xfe   : > { %2665 = vmatpush3.bf16.msra.mxu1 %v3451_v26 }
  0xff   : > { %2666 = vmatprep.subr.bf16.mxu1 %v3166_v4 }
 0x102   : > { %2668 = vmatpush3.bf16.msra.mxu1 %v3459_v32 }
 0x103   : > { %2669 = vmatprep.subr.bf16.mxu1 %v3166_v4 }
 0x106   : > { %2671 = vmatpush3.bf16.msra.mxu1 %v3467_v38 }
 0x107   : > { %2672 = vmatprep.subr.bf16.mxu1 %v3166_v4 }
 0x10a   : > { %2674 = vmatpush3.bf16.msra.mxu1 %v3475_v44 }
 0x10b   : > { %2675 = vmatprep.subr.bf16.mxu1 %v3166_v4 }
 0x10e   : > { %2677 = vmatpush3.bf16.msra.mxu1 %v3483_v50 }
 0x10f   : > { %2702 = vmatprep.subr.bf16.mxu1 %v3166_v4 }
 0x111   : > { %2204 = vmatmul.mubr.f32.vlgmr.msra.gmra.mrb[6].mxu1 %v1637_v11 }
 0x112   : > { %2704 = vmatpush3.bf16.msra.mxu1 %v3424_v9  ;;  %2273 = vmatprep.mubr.msk.f32.mxu1 %vm3167_vm0, %v3168_v12 }
 0x113   : > { %2705 = vmatprep.subr.bf16.mxu1 %v3166_v4 }
 0x116   : > { %2707 = vmatpush3.bf16.msra.mxu1 %v3435_v14 }
 0x117   : > { %2708 = vmatprep.subr.bf16.mxu1 %v3166_v4 }
 0x11a   : > { %2710 = vmatpush3.bf16.msra.mxu1 %v3443_v20 }
 0x11b   : > { %2711 = vmatprep.subr.bf16.mxu1 %v3166_v4 }
 0x11e   : > { %2713 = vmatpush3.bf16.msra.mxu1 %v3451_v26 }
 0x11f   : > { %2714 = vmatprep.subr.bf16.mxu1 %v3166_v4 }
 0x122   : > { %2716 = vmatpush3.bf16.msra.mxu1 %v3459_v32 }
 0x123   : > { %2717 = vmatprep.subr.bf16.mxu1 %v3166_v4 }
 0x126   : > { %2719 = vmatpush3.bf16.msra.mxu1 %v3467_v38 }
 0x127   : > { %2720 = vmatprep.subr.bf16.mxu1 %v3166_v4 }
 0x12a   : > { %2722 = vmatpush3.bf16.msra.mxu1 %v3475_v44 }
 0x12b   : > { %2723 = vmatprep.subr.bf16.mxu1 %v3166_v4 }
 0x12e   : > { %2725 = vmatpush3.bf16.msra.mxu1 %v3483_v50 }
 0x12f   : > { %2750 = vmatprep.subr.bf16.mxu1 %v3166_v4 }
 0x131   : > { %2274 = vmatmul.mubr.f32.vlgmr.msra.gmra.mrb[8].mxu1 %v1639_v24 }
 0x132   : > { %2752 = vmatpush3.bf16.msra.mxu1 %v3424_v9  ;;  %2343 = vmatprep.mubr.msk.f32.mxu1 %vm3167_vm0, %v3168_v12 }
 0x133   : > { %2753 = vmatprep.subr.bf16.mxu1 %v3166_v4 }
 0x136   : > { %2755 = vmatpush3.bf16.msra.mxu1 %v3435_v14 }
 0x137   : > { %2756 = vmatprep.subr.bf16.mxu1 %v3166_v4 }
 0x13a   : > { %2758 = vmatpush3.bf16.msra.mxu1 %v3443_v20 }
 0x13b   : > { %2759 = vmatprep.subr.bf16.mxu1 %v3166_v4 }
 0x13e   : > { %2761 = vmatpush3.bf16.msra.mxu1 %v3451_v26 }
 0x13f   : > { %2762 = vmatprep.subr.bf16.mxu1 %v3166_v4 }
 0x142   : > { %2764 = vmatpush3.bf16.msra.mxu1 %v3459_v32 }
 0x143   : > { %2765 = vmatprep.subr.bf16.mxu1 %v3166_v4 }
 0x146   : > { %2767 = vmatpush3.bf16.msra.mxu1 %v3467_v38 }
 0x147   : > { %2768 = vmatprep.subr.bf16.mxu1 %v3166_v4 }
 0x14a   : > { %2770 = vmatpush3.bf16.msra.mxu1 %v3475_v44 }
 0x14b   : > { %2771 = vmatprep.subr.bf16.mxu1 %v3166_v4 }
 0x14e   : > { %2773 = vmatpush3.bf16.msra.mxu1 %v3483_v50 }
 0x14f   : > { %2798 = vmatprep.subr.bf16.mxu1 %v3166_v4 }
 0x151   : > { %2344 = vmatmul.mubr.f32.vlgmr.msra.gmra.mrb[10].mxu1 %v1641_v36 }
 0x152   : > { %2800 = vmatpush3.bf16.msra.mxu1 %v3424_v9  ;;  %2413 = vmatprep.mubr.msk.f32.mxu1 %vm3167_vm0, %v3168_v12 }
 0x153   : > { %2801 = vmatprep.subr.bf16.mxu1 %v3166_v4 }
 0x156   : > { %2803 = vmatpush3.bf16.msra.mxu1 %v3435_v14 }
 0x157   : > { %2804 = vmatprep.subr.bf16.mxu1 %v3166_v4 }
 0x15a   : > { %2806 = vmatpush3.bf16.msra.mxu1 %v3443_v20 }
 0x15b   : > { %2807 = vmatprep.subr.bf16.mxu1 %v3166_v4 }
 0x15e   : > { %2809 = vmatpush3.bf16.msra.mxu1 %v3451_v26 }
 0x15f   : > { %2810 = vmatprep.subr.bf16.mxu1 %v3166_v4 }
 0x162   : > { %2812 = vmatpush3.bf16.msra.mxu1 %v3459_v32 }
 0x163   : > { %2813 = vmatprep.subr.bf16.mxu1 %v3166_v4 }
 0x166   : > { %2815 = vmatpush3.bf16.msra.mxu1 %v3467_v38 }
 0x167   : > { %2816 = vmatprep.subr.bf16.mxu1 %v3166_v4 }
 0x16a   : > { %2818 = vmatpush3.bf16.msra.mxu1 %v3475_v44 }
 0x16b   : > { %2819 = vmatprep.subr.bf16.mxu1 %v3166_v4 }
 0x16e   : > { %2821 = vmatpush3.bf16.msra.mxu1 %v3483_v50 }
 0x16f   : > { %2846 = vmatprep.subr.bf16.mxu1 %v3166_v4 }
 0x171   : > { %2414 = vmatmul.mubr.f32.vlgmr.msra.gmra.mrb[12].mxu1 %v1643_v48 }
 0x172   : > { %2848 = vmatpush3.bf16.msra.mxu1 %v3424_v9  ;;  %2483 = vmatprep.mubr.msk.f32.mxu1 %vm3167_vm0, %v3168_v12 }
 0x173   : > { %2849 = vmatprep.subr.bf16.mxu1 %v3166_v4 }
 0x176   : > { %2851 = vmatpush3.bf16.msra.mxu1 %v3435_v14 }
 0x177   : > { %2852 = vmatprep.subr.bf16.mxu1 %v3166_v4 }
 0x17a   : > { %2854 = vmatpush3.bf16.msra.mxu1 %v3443_v20 }
 0x17b   : > { %2855 = vmatprep.subr.bf16.mxu1 %v3166_v4 }
 0x17e   : > { %2857 = vmatpush3.bf16.msra.mxu1 %v3451_v26 }
 0x17f   : > { %2858 = vmatprep.subr.bf16.mxu1 %v3166_v4 }
 0x182   : > { %2860 = vmatpush3.bf16.msra.mxu1 %v3459_v32 }
 0x183   : > { %v394_v54 = vpop.f32.mrb[0].mxu0  ;;  %2861 = vmatprep.subr.bf16.mxu1 %v3166_v4 }
 0x184   : > { %v464_v56 = vpop.f32.mrb[0].mxu1  ;;  %v1960_v57 = vpop.f32.mrb[1].mxu0 }
 0x185   : > { %v465_v58 = vadd.f32 %v464_v56, %v394_v54  ;;  %v1995_v59 = vpop.f32.mrb[1].mxu1 }
 0x186   : > { %2863 = vmatpush3.bf16.msra.mxu1 %v3467_v38 }
 0x187   : > { %v474_v60 = vadd.f32 %v3549_v55, %v465_v58  ;;  %2864 = vmatprep.subr.bf16.mxu1 %v3166_v4 }
 0x189   : > { %2954 = vtanh.f32 %v474_v60 }
 0x18a   : > { %2866 = vmatpush3.bf16.msra.mxu1 %v3475_v44 }
 0x18b   : > { %2867 = vmatprep.subr.bf16.mxu1 %v3166_v4 }
 0x18e   : > { %2869 = vmatpush3.bf16.msra.mxu1 %v3483_v50 }
 0x193   : > { %v2955_v61 = vpop.eup %2954 }
 0x194   : > { %476 = vst [vmem:[%s3416_s26] sm:$0xff] %v2955_v61  ;;  %2029 = vmatmul.mubr.f32.vlgmr.msra.gmra.mrb[2].mxu0 %v2955_v61 }
 0x195   : > { %2584 = vmatpush3.bf16.msra.mxu0 %v3422_v5  ;;  %2098 = vmatprep.mubr.msk.f32.mxu0 %vm3167_vm0, %v3168_v12 }
 0x196   : > { %2585 = vmatprep.subr.bf16.mxu0 %v3166_v4 }
 0x199   : > { %2587 = vmatpush3.bf16.msra.mxu0 %v3431_v13 }
 0x19a   : > { %2588 = vmatprep.subr.bf16.mxu0 %v3166_v4 }
 0x19d   : > { %2590 = vmatpush3.bf16.msra.mxu0 %v3439_v19 }
 0x19e   : > { %2591 = vmatprep.subr.bf16.mxu0 %v3166_v4 }
 0x1a1   : > { %2593 = vmatpush3.bf16.msra.mxu0 %v3447_v25 }
 0x1a2   : > { %2594 = vmatprep.subr.bf16.mxu0 %v3166_v4 }
 0x1a4   : > { %v615_v62 = vpop.f32.mrb[2].mxu1 }
 0x1a5   : > { %2596 = vmatpush3.bf16.msra.mxu0 %v3455_v31  ;;  %v2065_v63 = vpop.f32.mrb[3].mxu1 }
 0x1a6   : > { %2597 = vmatprep.subr.bf16.mxu0 %v3166_v4 }
 0x1a9   : > { %2599 = vmatpush3.bf16.msra.mxu0 %v3463_v37 }
 0x1aa   : > { %2600 = vmatprep.subr.bf16.mxu0 %v3166_v4 }
 0x1ad   : > { %2602 = vmatpush3.bf16.msra.mxu0 %v3471_v43 }
 0x1ae   : > { %2603 = vmatprep.subr.bf16.mxu0 %v3166_v4 }
 0x1b1   : > { %2605 = vmatpush3.bf16.msra.mxu0 %v3479_v49 }
 0x1b2   : > { %2630 = vmatprep.subr.bf16.mxu0 %v3166_v4 }
 0x1c4   : > { %v761_v8 = vpop.f32.mrb[4].mxu1 }
 0x1c5   : > { %v2135_v10 = vpop.f32.mrb[5].mxu1 }
 0x1e4   : > { %v907_v22 = vpop.f32.mrb[6].mxu1 }
 0x1e5   : > { %v2205_v23 = vpop.f32.mrb[7].mxu1 }
 0x204   : > { %v1053_v34 = vpop.f32.mrb[8].mxu1 }
 0x205   : > { %v2275_v35 = vpop.f32.mrb[9].mxu1 }
 0x224   : > { %v1199_v46 = vpop.f32.mrb[10].mxu1 }
 0x225   : > { %v2345_v47 = vpop.f32.mrb[11].mxu1 }
 0x267   : > { %v545_v1 = vpop.f32.mrb[2].mxu0 }
 0x268   : > { %v616_v2 = vadd.f32 %v615_v62, %v545_v1  ;;  %v2030_v3 = vpop.f32.mrb[3].mxu0 }
 0x26a   : > { %v619_v6 = vadd.f32 %v3549_v55, %v616_v2 }
 0x26c   : > { %2956 = vtanh.f32 %v619_v6 }
 0x276   : > { %v2957_v7 = vpop.eup %2956 }
 0x277   : > { %1634 = vst [vmem:[%s3416_s26 + $0x8] sm:$0xff] %v2957_v7  ;;  %2099 = vmatmul.mubr.f32.vlgmr.msra.gmra.mrb[4].mxu0 %v2957_v7 }
 0x278   : > { %2632 = vmatpush3.bf16.msra.mxu0 %v3422_v5  ;;  %2168 = vmatprep.mubr.msk.f32.mxu0 %vm3167_vm0, %v3168_v12 }
 0x279   : > { %2633 = vmatprep.subr.bf16.mxu0 %v3166_v4 }
 0x27c   : > { %2635 = vmatpush3.bf16.msra.mxu0 %v3431_v13 }
 0x27d   : > { %2636 = vmatprep.subr.bf16.mxu0 %v3166_v4 }
 0x280   : > { %2638 = vmatpush3.bf16.msra.mxu0 %v3439_v19 }
 0x281   : > { %2639 = vmatprep.subr.bf16.mxu0 %v3166_v4 }
 0x284   : > { %2641 = vmatpush3.bf16.msra.mxu0 %v3447_v25 }
 0x285   : > { %2642 = vmatprep.subr.bf16.mxu0 %v3166_v4 }
 0x288   : > { %2644 = vmatpush3.bf16.msra.mxu0 %v3455_v31 }
 0x289   : > { %2645 = vmatprep.subr.bf16.mxu0 %v3166_v4 }
 0x28c   : > { %2647 = vmatpush3.bf16.msra.mxu0 %v3463_v37 }
 0x28d   : > { %2648 = vmatprep.subr.bf16.mxu0 %v3166_v4 }
 0x290   : > { %2650 = vmatpush3.bf16.msra.mxu0 %v3471_v43 }
 0x291   : > { %2651 = vmatprep.subr.bf16.mxu0 %v3166_v4 }
 0x294   : > { %2653 = vmatpush3.bf16.msra.mxu0 %v3479_v49 }
 0x295   : > { %2678 = vmatprep.subr.bf16.mxu0 %v3166_v4 }
 0x34a   : > { %v691_v15 = vpop.f32.mrb[4].mxu0 }
 0x34b   : > { %v762_v16 = vadd.f32 %v761_v8, %v691_v15  ;;  %v2100_v17 = vpop.f32.mrb[5].mxu0 }
 0x34d   : > { %v765_v18 = vadd.f32 %v3549_v55, %v762_v16 }
 0x34f   : > { %2958 = vtanh.f32 %v765_v18 }
 0x359   : > { %v2959_v21 = vpop.eup %2958 }
 0x35a   : > { %1636 = vst [vmem:[%s3416_s26 + $0x10] sm:$0xff] %v2959_v21  ;;  %2169 = vmatmul.mubr.f32.vlgmr.msra.gmra.mrb[6].mxu0 %v2959_v21 }
 0x35b   : > { %2680 = vmatpush3.bf16.msra.mxu0 %v3422_v5  ;;  %2238 = vmatprep.mubr.msk.f32.mxu0 %vm3167_vm0, %v3168_v12 }
 0x35c   : > { %2681 = vmatprep.subr.bf16.mxu0 %v3166_v4 }
 0x35f   : > { %2683 = vmatpush3.bf16.msra.mxu0 %v3431_v13 }
 0x360   : > { %2684 = vmatprep.subr.bf16.mxu0 %v3166_v4 }
 0x363   : > { %2686 = vmatpush3.bf16.msra.mxu0 %v3439_v19 }
 0x364   : > { %2687 = vmatprep.subr.bf16.mxu0 %v3166_v4 }
 0x367   : > { %2689 = vmatpush3.bf16.msra.mxu0 %v3447_v25 }
 0x368   : > { %2690 = vmatprep.subr.bf16.mxu0 %v3166_v4 }
 0x36b   : > { %2692 = vmatpush3.bf16.msra.mxu0 %v3455_v31 }
 0x36c   : > { %2693 = vmatprep.subr.bf16.mxu0 %v3166_v4 }
 0x36f   : > { %2695 = vmatpush3.bf16.msra.mxu0 %v3463_v37 }
 0x370   : > { %2696 = vmatprep.subr.bf16.mxu0 %v3166_v4 }
 0x373   : > { %2698 = vmatpush3.bf16.msra.mxu0 %v3471_v43 }
 0x374   : > { %2699 = vmatprep.subr.bf16.mxu0 %v3166_v4 }
 0x377   : > { %2701 = vmatpush3.bf16.msra.mxu0 %v3479_v49 }
 0x378   : > { %2726 = vmatprep.subr.bf16.mxu0 %v3166_v4 }
 0x42d   : > { %v837_v27 = vpop.f32.mrb[6].mxu0 }
 0x42e   : > { %v908_v28 = vadd.f32 %v907_v22, %v837_v27  ;;  %v2170_v29 = vpop.f32.mrb[7].mxu0 }
 0x430   : > { %v911_v30 = vadd.f32 %v3549_v55, %v908_v28 }
 0x432   : > { %2960 = vtanh.f32 %v911_v30 }
 0x43c   : > { %v2961_v33 = vpop.eup %2960 }
 0x43d   : > { %1638 = vst [vmem:[%s3416_s26 + $0x18] sm:$0xff] %v2961_v33  ;;  %2239 = vmatmul.mubr.f32.vlgmr.msra.gmra.mrb[8].mxu0 %v2961_v33 }
 0x43e   : > { %2728 = vmatpush3.bf16.msra.mxu0 %v3422_v5  ;;  %2308 = vmatprep.mubr.msk.f32.mxu0 %vm3167_vm0, %v3168_v12 }
 0x43f   : > { %2729 = vmatprep.subr.bf16.mxu0 %v3166_v4 }
 0x442   : > { %2731 = vmatpush3.bf16.msra.mxu0 %v3431_v13 }
 0x443   : > { %2732 = vmatprep.subr.bf16.mxu0 %v3166_v4 }
 0x446   : > { %2734 = vmatpush3.bf16.msra.mxu0 %v3439_v19 }
 0x447   : > { %2735 = vmatprep.subr.bf16.mxu0 %v3166_v4 }
 0x44a   : > { %2737 = vmatpush3.bf16.msra.mxu0 %v3447_v25 }
 0x44b   : > { %2738 = vmatprep.subr.bf16.mxu0 %v3166_v4 }
 0x44e   : > { %2740 = vmatpush3.bf16.msra.mxu0 %v3455_v31 }
 0x44f   : > { %2741 = vmatprep.subr.bf16.mxu0 %v3166_v4 }
 0x452   : > { %2743 = vmatpush3.bf16.msra.mxu0 %v3463_v37 }
 0x453   : > { %2744 = vmatprep.subr.bf16.mxu0 %v3166_v4 }
 0x456   : > { %2746 = vmatpush3.bf16.msra.mxu0 %v3471_v43 }
 0x457   : > { %2747 = vmatprep.subr.bf16.mxu0 %v3166_v4 }
 0x45a   : > { %2749 = vmatpush3.bf16.msra.mxu0 %v3479_v49 }
 0x45b   : > { %2774 = vmatprep.subr.bf16.mxu0 %v3166_v4 }
 0x510   : > { %v983_v39 = vpop.f32.mrb[8].mxu0 }
 0x511   : > { %v1054_v40 = vadd.f32 %v1053_v34, %v983_v39  ;;  %v2240_v41 = vpop.f32.mrb[9].mxu0 }
 0x513   : > { %v1057_v42 = vadd.f32 %v3549_v55, %v1054_v40 }
 0x515   : > { %2962 = vtanh.f32 %v1057_v42 }
 0x51f   : > { %v2963_v45 = vpop.eup %2962 }
 0x520   : > { %1640 = vst [vmem:[%s3416_s26 + $0x20] sm:$0xff] %v2963_v45  ;;  %2309 = vmatmul.mubr.f32.vlgmr.msra.gmra.mrb[10].mxu0 %v2963_v45 }
 0x521   : > { %2776 = vmatpush3.bf16.msra.mxu0 %v3422_v5  ;;  %2378 = vmatprep.mubr.msk.f32.mxu0 %vm3167_vm0, %v3168_v12 }
 0x522   : > { %2777 = vmatprep.subr.bf16.mxu0 %v3166_v4 }
 0x525   : > { %2779 = vmatpush3.bf16.msra.mxu0 %v3431_v13 }
 0x526   : > { %2780 = vmatprep.subr.bf16.mxu0 %v3166_v4 }
 0x529   : > { %2782 = vmatpush3.bf16.msra.mxu0 %v3439_v19 }
 0x52a   : > { %2783 = vmatprep.subr.bf16.mxu0 %v3166_v4 }
 0x52d   : > { %2785 = vmatpush3.bf16.msra.mxu0 %v3447_v25 }
 0x52e   : > { %2786 = vmatprep.subr.bf16.mxu0 %v3166_v4 }
 0x531   : > { %2788 = vmatpush3.bf16.msra.mxu0 %v3455_v31 }
 0x532   : > { %2789 = vmatprep.subr.bf16.mxu0 %v3166_v4 }
 0x535   : > { %2791 = vmatpush3.bf16.msra.mxu0 %v3463_v37 }
 0x536   : > { %2792 = vmatprep.subr.bf16.mxu0 %v3166_v4 }
 0x539   : > { %2794 = vmatpush3.bf16.msra.mxu0 %v3471_v43 }
 0x53a   : > { %2795 = vmatprep.subr.bf16.mxu0 %v3166_v4 }
 0x53d   : > { %2797 = vmatpush3.bf16.msra.mxu0 %v3479_v49 }
 0x53e   : > { %2822 = vmatprep.subr.bf16.mxu0 %v3166_v4 }
 0x5f3   : > { %v1129_v9 = vpop.f32.mrb[10].mxu0 }
 0x5f4   : > { %v1200_v14 = vadd.f32 %v1199_v46, %v1129_v9  ;;  %v2310_v20 = vpop.f32.mrb[11].mxu0 }
 0x5f6   : > { %v1203_v26 = vadd.f32 %v3549_v55, %v1200_v14 }
 0x5f8   : > { %2964 = vtanh.f32 %v1203_v26 }
 0x602   : > { %v2965_v51 = vpop.eup %2964 }
 0x603   : > { %1642 = vst [vmem:[%s3416_s26 + $0x28] sm:$0xff] %v2965_v51  ;;  %2379 = vmatmul.mubr.f32.vlgmr.msra.gmra.mrb[12].mxu0 %v2965_v51 }
 0x604   : > { %2824 = vmatpush3.bf16.msra.mxu0 %v3422_v5  ;;  %2448 = vmatprep.mubr.msk.f32.mxu0 %vm3167_vm0, %v3168_v12  ;;  %v1345_v5 = vpop.f32.mrb[12].mxu1 }
 0x605   : > { %2825 = vmatprep.subr.bf16.mxu0 %v3166_v4  ;;  %v2415_v12 = vpop.f32.mrb[13].mxu1 }
 0x608   : > { %2827 = vmatpush3.bf16.msra.mxu0 %v3431_v13  ;;  %v1645_v13 = vld [vmem:[%s3402_s10 + $0x38] sm:$0xff] }
 0x609   : > { %2828 = vmatprep.subr.bf16.mxu0 %v3166_v4  ;;  %2484 = vmatmul.mubr.f32.vlgmr.msra.gmra.mrb[14].mxu1 %v1645_v13 }
 0x60c   : > { %2830 = vmatpush3.bf16.msra.mxu0 %v3439_v19 }
 0x60d   : > { %2831 = vmatprep.subr.bf16.mxu0 %v3166_v4 }
 0x610   : > { %2833 = vmatpush3.bf16.msra.mxu0 %v3447_v25 }
 0x611   : > { %2834 = vmatprep.subr.bf16.mxu0 %v3166_v4 }
 0x614   : > { %2836 = vmatpush3.bf16.msra.mxu0 %v3455_v31 }
 0x615   : > { %2837 = vmatprep.subr.bf16.mxu0 %v3166_v4 }
 0x618   : > { %2839 = vmatpush3.bf16.msra.mxu0 %v3463_v37 }
 0x619   : > { %2840 = vmatprep.subr.bf16.mxu0 %v3166_v4 }
 0x61c   : > { %2842 = vmatpush3.bf16.msra.mxu0 %v3471_v43 }
 0x61d   : > { %2843 = vmatprep.subr.bf16.mxu0 %v3166_v4 }
 0x620   : > { %2845 = vmatpush3.bf16.msra.mxu0 %v3479_v49 }
 0x6d6   : > { %v1275_v19 = vpop.f32.mrb[12].mxu0 }
 0x6d7   : > { %v1346_v25 = vadd.f32 %v1345_v5, %v1275_v19  ;;  %v2380_v31 = vpop.f32.mrb[13].mxu0 }
 0x6d9   : > { %v1349_v32 = vadd.f32 %v3549_v55, %v1346_v25 }
 0x6db   : > { %2966 = vtanh.f32 %v1349_v32 }
 0x6dc   : > { %v1491_v4 = vpop.f32.mrb[14].mxu1 }
 0x6dd   : > { %v2485_v38 = vpop.f32.mrb[15].mxu1 }
 0x6e5   : > { %v2967_v37 = vpop.eup %2966 }
 0x6e6   : > { %1644 = vst [vmem:[%s3416_s26 + $0x30] sm:$0xff] %v2967_v37  ;;  %2449 = vmatmul.mubr.f32.vlgmr.msra.gmra.mrb[14].mxu0 %v2967_v37 }
 0x7b9   : > { %v1421_v43 = vpop.f32.mrb[14].mxu0 }
 0x7ba   : > { %v1492_v44 = vadd.f32 %v1491_v4, %v1421_v43  ;;  %v2450_v49 = vpop.f32.mrb[15].mxu0 }
 0x7bc   : > { %v1495_v50 = vadd.f32 %v3549_v55, %v1492_v44 }
 0x7be   : > { %2968 = vtanh.f32 %v1495_v50 }
 0x7c8   : > { %v2969_v52 = vpop.eup %2968 }
 0x7c9   : > { %1646 = vst [vmem:[%s3416_s26 + $0x38] sm:$0xff] %v2969_v52  ;;  %1499 = vst [vmem:[#allocation2] sm:$0xff] %v2969_v52 }
 0x7ca   : > { %3097 = shalt.err (!%p3094_p13)
}
 0x7cb   : > { %s3098_s8 = scalar_lea.hbm %s3773_s28, 1024  ;;  %s3102_s26 = scalar_lea.hbm %s3825_s5, 2048 }
 0x7cc   : > { %p3099_p5 = scmp.ne.s32.totalorder %s3773_s28, %s3098_s8  ;;  %p3103_p10 = scmp.lt.u32.totalorder %s3773_s28, %s3825_s5 }
 0x7cd   : > { %p3104_p2 = scmp.lt.u32.totalorder %s3102_s26, %s3098_s8  ;;  %p3106_p4 = scmp.lt.u32.totalorder %s3098_s8, %s3773_s28 }
 0x7ce   : > { %p3100_p12 = pnand %p3099_p5, %p3347_p6 }
 0x7cf   : > { %p3105_p1 = por %p3104_p2, %p3103_p10 }
 0x7d0   : > { %p3101_p8 = pneg %p3100_p12 }
 0x7d1   : > { %p3107_p9 = por %p3106_p4, %p3105_p1 }
 0x7d3   : > { %p3108_p3 = pnand %p3107_p9, %p3101_p8 }
 0x7d5   : > { %3111 = shalt.err (!%p3108_p3)
}
 0x7d6   : > { %s3170_s16 = smov 128   ;;  %s3171_s13 = smov 8  }
 0x7d7   : > { %2884 = dma.vmem_to_hbm [thread:$0]  (%p3347_p6), %s3775_s11, 1024, %s3773_s28, %s1501_s29, %s3170_s16, %s3170_s16, %s3171_s13  }
 0x7d8 PF: > { %s1529_s30 = sand.u32 1, %s3146_s18   ;;  %p3844_p7 = scmp.ne.s32.totalorder %s3830_s25, 0 }
 0x7d9   : > { %p3845_p11 = scmp.ge.s32.totalorder %s3158_s21, 2  ;;  %s1530_s12 = scalar_lea.sflag [#allocation5], %s1529_s30 }
 0x7db   : > { %p2901_p0 = pnand %p3845_p11, %p3844_p7 }
 0x7dd   : > { %3141 = dma.done.wait (!%p2901_p0), %s1530_s12, 1024  }
 0x7de   : > { %3143 = vsyncadd (!%p2901_p0), %s1530_s12, 4294966272  ;;  %p20_p13 = scmp.ge.s32.totalorder %s3333_s14, 4   ;;  %s3846_s18 = smov %s3150_s19 }
 0x7df   : > { %s3847_s19 = smov %s3154_s20  ;;  %s3848_s20 = smov %s3343_s23 }
 0x7e0   : > { %s3849_s21 = smov %s3333_s14  ;;  %22 = sbr.rel (!%p20_p13) target bundleno = 7 (0x7), region = 115 }
 0x7e7   :  { %1535 = vsyncpa [#allocation4], 1 }
 0x7e8   :  { %1537 = vsyncpa [#allocation4 + $0x1], 1 }
 0x7e9   :  { %1538 = vsyncpa [#allocation7], 1 }
 0x7ea   :  { %1539 = vsyncpa [#allocation10], 1 }
 0x7eb   :  { %1540 = vsyncpa [#allocation5], 1 }
 0x7ec   :  { %1542 = vsyncpa [#allocation5 + $0x1], 1 }

</bundles_post_ra>
